<compile_context>
chip_gen: v6e
topology: v6e:2x2x1
jax: 0.10.0
libtpu: 0.0.40
codegen_flags: <defaults>
</compile_context>

<pallas_src>
import functools

import jax
import jax.numpy as jnp
from jax.experimental import pallas as pl
from jax.experimental.pallas import tpu as pltpu

LANES = 128
MAX_TILE_ROWS = 2048   # (2048, 128) f32 block = 1 MiB per input


def _round_up(x, m):
    return (x + m - 1) // m * m


def _bce_dice_kernel(pr_ref, gt_ref, out_ref, tp_acc, spg_acc, bce_acc,
                     *, eps, n_valid, need_mask):
    i = pl.program_id(0)

    @pl.when(i == 0)
    def _init():
        tp_acc[...] = jnp.zeros_like(tp_acc)
        spg_acc[...] = jnp.zeros_like(spg_acc)
        bce_acc[...] = jnp.zeros_like(bce_acc)

    x = pr_ref[...].astype(jnp.float32)   # logits (native dtype DMA'd, cast here)
    y = gt_ref[...].astype(jnp.float32)   # targets in [0, 1]

    # Shared transcendental: e = exp(-|x|) is reused by sigmoid and BCE.
    e = jnp.exp(-jnp.abs(x))
    d = 1.0 / (1.0 + e)                        # exact recip keeps f32 accuracy
    p = jnp.where(x >= 0.0, d, e * d)          # sigmoid(x)
    # numerically-stable BCEWithLogits:  max(x,0) - x*y + log(1 + exp(-|x|))
    bce = jnp.maximum(x, 0.0) - x * y + jnp.log1p(e)

    tp_c = y * p          # true positives
    spg_c = p + y         # sum(sigmoid) + sum(gt)  (dice denominator)
    bce_c = bce

    if need_mask:
        # Zero contributions from the ragged / padded tail (flat idx >= n_valid).
        tr, ln = x.shape
        row = jax.lax.broadcasted_iota(jnp.int32, (tr, ln), 0)
        lane = jax.lax.broadcasted_iota(jnp.int32, (tr, ln), 1)
        flat = (i * tr + row) * ln + lane
        valid = flat < n_valid
        zero = jnp.zeros_like(x)
        tp_c = jnp.where(valid, tp_c, zero)
        spg_c = jnp.where(valid, spg_c, zero)
        bce_c = jnp.where(valid, bce_c, zero)

    # Per-step: reduce only along the row axis into (1, 128) vector accumulators
    # (VPU adds + a single sublane reduce); no per-step cross-lane -> SMEM scalars.
    tp_acc[...] += jnp.sum(tp_c, axis=0, keepdims=True)
    spg_acc[...] += jnp.sum(spg_c, axis=0, keepdims=True)
    bce_acc[...] += jnp.sum(bce_c, axis=0, keepdims=True)

    @pl.when(i == pl.num_programs(0) - 1)
    def _finalize():
        tp = jnp.sum(tp_acc[...])
        spg = jnp.sum(spg_acc[...])
        bce_sum = jnp.sum(bce_acc[...])
        # f_score (beta=1): (2*tp + eps) / (2*tp + fn + fp + eps)
        #   with fp = sum(p) - tp, fn = sum(y) - tp  =>  denom = spg + eps
        score = (2.0 * tp + eps) / (spg + eps)
        dice = 1.0 - score
        bce_mean = bce_sum / jnp.float32(n_valid)
        out_ref[0, 0] = dice + bce_mean


def bce_dice_loss(y_pr, y_gt, eps=1e-7):
    """BCEDiceLoss forward: returns a scalar f32.

    y_pr: logits, any shape (e.g. NCHW).  y_gt: targets in [0, 1], same shape.
    """
    assert y_pr.shape == y_gt.shape
    n_valid = int(y_pr.size)

    # Flatten to a lane-dense (rows, 128) slab. No dtype cast here (cast in
    # kernel) and no full padded copy: only a tiny <128-element pad if the
    # total size is not a multiple of 128 (padding values are masked anyway).
    flat_pr = jnp.ravel(y_pr)
    flat_gt = jnp.ravel(y_gt)
    rem = n_valid % LANES
    if rem:
        pad = LANES - rem
        flat_pr = jnp.pad(flat_pr, (0, pad))
        flat_gt = jnp.pad(flat_gt, (0, pad))
    rows = flat_pr.size // LANES
    pr2d = flat_pr.reshape(rows, LANES)
    gt2d = flat_gt.reshape(rows, LANES)

    # Big tiles (multiple of 8 rows); ragged last tile handled by in-kernel mask.
    tile_rows = min(MAX_TILE_ROWS, _round_up(rows, 8))
    n_blocks = pl.cdiv(rows, tile_rows)
    need_mask = (rem != 0) or (rows % tile_rows != 0)

    kernel = functools.partial(
        _bce_dice_kernel, eps=float(eps), n_valid=n_valid, need_mask=need_mask)

    out = pl.pallas_call(
        kernel,
        out_shape=jax.ShapeDtypeStruct((1, 1), jnp.float32),
        grid_spec=pltpu.PrefetchScalarGridSpec(
            num_scalar_prefetch=0,
            grid=(n_blocks,),
            in_specs=[
                pl.BlockSpec((tile_rows, LANES), lambda i: (i, 0)),
                pl.BlockSpec((tile_rows, LANES), lambda i: (i, 0)),
            ],
            out_specs=pl.BlockSpec(memory_space=pltpu.SMEM),
            scratch_shapes=[
                pltpu.VMEM((1, LANES), jnp.float32),   # sum(y * sigmoid(x))
                pltpu.VMEM((1, LANES), jnp.float32),   # sum(sigmoid(x)) + sum(y)
                pltpu.VMEM((1, LANES), jnp.float32),   # sum(bce elementwise)
            ],
        ),
        compiler_params=pltpu.CompilerParams(
            dimension_semantics=("arbitrary",)),
    )(pr2d, gt2d)
    return out[0, 0]


def _reference(y_pr, y_gt, eps=1e-7):
    """Plain-JAX reference mirroring the PyTorch module."""
    x = y_pr.astype(jnp.float32)
    y = y_gt.astype(jnp.float32)
    p = jax.nn.sigmoid(x)
    tp = jnp.sum(y * p)
    fp = jnp.sum(p) - tp
    fn = jnp.sum(y) - tp
    score = (2.0 * tp + eps) / (2.0 * tp + fn + fp + eps)
    dice = 1.0 - score
    bce = jnp.mean(jnp.maximum(x, 0.0) - x * y + jnp.log1p(jnp.exp(-jnp.abs(x))))
    return dice + bce


if __name__ == "__main__":
    key = jax.random.PRNGKey(0)
    k1, k2 = jax.random.split(key)
    # NCHW, like the PyTorch conv-output convention.
    B, C, H, W = 2, 4, 16, 16
    y_pr = jax.random.normal(k1, (B, C, H, W), dtype=jnp.float32)       # logits
    y_gt = (jax.random.uniform(k2, (B, C, H, W)) > 0.5).astype(jnp.float32)

    loss = jax.block_until_ready(bce_dice_loss(y_pr, y_gt))
    ref = jax.block_until_ready(_reference(y_pr, y_gt))

    assert jnp.allclose(loss, ref, rtol=1e-5, atol=1e-5), (loss, ref)
    print("KERNEL_OK")
</pallas_src>

<mosaic_0001>
module attributes {stable_mosaic.version = 11 : i64} {
  func.func @_bce_dice_kernel(%arg0: i32, %arg1: memref<16x128xf32, #tpu.memory_space<vmem>>, %arg2: memref<16x128xf32, #tpu.memory_space<vmem>>, %arg3: memref<1x1xf32, #tpu.memory_space<smem>>, %arg4: memref<1x128xf32, #tpu.memory_space<vmem>>, %arg5: memref<1x128xf32, #tpu.memory_space<vmem>>, %arg6: memref<1x128xf32, #tpu.memory_space<vmem>>) attributes {dimension_semantics = [#tpu.dimension_semantics<arbitrary>], iteration_bounds = array<i64: 1>, scalar_prefetch = 0 : i64, scratch_operands = 3 : i64, tpu.core_type = #tpu.core_type<tc>, window_params = [{transform_indices = @transform_0, window_bounds = array<i64: 16, 128>}, {transform_indices = @transform_1, window_bounds = array<i64: 16, 128>}, {transform_indices = @transform_2, window_bounds = array<i64: 1, 1>}]} {
    %c0_i32 = arith.constant 0 : i32
    %0 = arith.cmpi eq, %arg0, %c0_i32 : i32
    %1 = arith.extui %0 : i1 to i32
    %c0_i32_0 = arith.constant 0 : i32
    %2 = arith.cmpi ne, %1, %c0_i32_0 : i32
    scf.if %2 {
      %cst_25 = arith.constant 0.000000e+00 : f32
      %43 = vector.broadcast %cst_25 : f32 to vector<1x128xf32>
      %c0_26 = arith.constant 0 : index
      %c0_27 = arith.constant 0 : index
      %44 = vector.load %arg4[%c0_26, %c0_27] : memref<1x128xf32, #tpu.memory_space<vmem>>, vector<1x128xf32>
      tpu.vector_store %arg4[%c0_26, %c0_27], %43 {strides = array<i32>} : memref<1x128xf32, #tpu.memory_space<vmem>>, vector<1x128xf32>,
      %cst_28 = arith.constant 0.000000e+00 : f32
      %45 = vector.broadcast %cst_28 : f32 to vector<1x128xf32>
      %c0_29 = arith.constant 0 : index
      %c0_30 = arith.constant 0 : index
      %46 = vector.load %arg5[%c0_29, %c0_30] : memref<1x128xf32, #tpu.memory_space<vmem>>, vector<1x128xf32>
      tpu.vector_store %arg5[%c0_29, %c0_30], %45 {strides = array<i32>} : memref<1x128xf32, #tpu.memory_space<vmem>>, vector<1x128xf32>,
      %cst_31 = arith.constant 0.000000e+00 : f32
      %47 = vector.broadcast %cst_31 : f32 to vector<1x128xf32>
      %c0_32 = arith.constant 0 : index
      %c0_33 = arith.constant 0 : index
      %48 = vector.load %arg6[%c0_32, %c0_33] : memref<1x128xf32, #tpu.memory_space<vmem>>, vector<1x128xf32>
      tpu.vector_store %arg6[%c0_32, %c0_33], %47 {strides = array<i32>} : memref<1x128xf32, #tpu.memory_space<vmem>>, vector<1x128xf32>,
    } else {
    }
    %c0 = arith.constant 0 : index
    %c0_1 = arith.constant 0 : index
    %3 = vector.load %arg1[%c0, %c0_1] : memref<16x128xf32, #tpu.memory_space<vmem>>, vector<16x128xf32>
    %c0_2 = arith.constant 0 : index
    %c0_3 = arith.constant 0 : index
    %4 = vector.load %arg2[%c0_2, %c0_3] : memref<16x128xf32, #tpu.memory_space<vmem>>, vector<16x128xf32>
    %5 = math.absf %3 : vector<16x128xf32>
    %cst = arith.constant 0.000000e+00 : f32
    %6 = vector.broadcast %cst : f32 to vector<16x128xf32>
    %7 = arith.subf %6, %5 : vector<16x128xf32>
    %8 = math.exp %7 : vector<16x128xf32>
    %cst_4 = arith.constant 1.000000e+00 : f32
    %9 = vector.broadcast %cst_4 : f32 to vector<16x128xf32>
    %10 = arith.addf %9, %8 : vector<16x128xf32>
    %cst_5 = arith.constant 1.000000e+00 : f32
    %11 = vector.broadcast %cst_5 : f32 to vector<16x128xf32>
    %12 = arith.divf %11, %10 : vector<16x128xf32>
    %cst_6 = arith.constant 0.000000e+00 : f32
    %13 = vector.broadcast %cst_6 : f32 to vector<16x128xf32>
    %14 = arith.cmpf oge, %3, %13 : vector<16x128xf32>
    %15 = arith.mulf %8, %12 : vector<16x128xf32>
    %16 = arith.select %14, %12, %15 : vector<16x128xi1>, vector<16x128xf32>
    %cst_7 = arith.constant 0.000000e+00 : f32
    %17 = vector.broadcast %cst_7 : f32 to vector<16x128xf32>
    %18 = arith.maximumf %3, %17 : vector<16x128xf32>
    %19 = arith.mulf %3, %4 : vector<16x128xf32>
    %20 = arith.subf %18, %19 : vector<16x128xf32>
    %21 = math.log1p %8 : vector<16x128xf32>
    %22 = arith.addf %20, %21 : vector<16x128xf32>
    %23 = arith.mulf %4, %16 : vector<16x128xf32>
    %24 = arith.addf %16, %4 : vector<16x128xf32>
    %c0_8 = arith.constant 0 : index
    %c0_9 = arith.constant 0 : index
    %25 = vector.load %arg4[%c0_8, %c0_9] : memref<1x128xf32, #tpu.memory_space<vmem>>, vector<1x128xf32>
    %cst_10 = arith.constant dense<0.000000e+00> : vector<128xf32>
    %26 = vector.multi_reduction <add>, %23, %cst_10 [0] : vector<16x128xf32> to vector<128xf32>
    %27 = vector.shape_cast %26 : vector<128xf32> to vector<1x128xf32>
    %28 = arith.addf %25, %27 : vector<1x128xf32>
    %c0_11 = arith.constant 0 : index
    %c0_12 = arith.constant 0 : index
    %29 = vector.load %arg4[%c0_11, %c0_12] : memref<1x128xf32, #tpu.memory_space<vmem>>, vector<1x128xf32>
    tpu.vector_store %arg4[%c0_11, %c0_12], %28 {strides = array<i32>} : memref<1x128xf32, #tpu.memory_space<vmem>>, vector<1x128xf32>,
    %c0_13 = arith.constant 0 : index
    %c0_14 = arith.constant 0 : index
    %30 = vector.load %arg5[%c0_13, %c0_14] : memref<1x128xf32, #tpu.memory_space<vmem>>, vector<1x128xf32>
    %cst_15 = arith.constant dense<0.000000e+00> : vector<128xf32>
    %31 = vector.multi_reduction <add>, %24, %cst_15 [0] : vector<16x128xf32> to vector<128xf32>
    %32 = vector.shape_cast %31 : vector<128xf32> to vector<1x128xf32>
    %33 = arith.addf %30, %32 : vector<1x128xf32>
    %c0_16 = arith.constant 0 : index
    %c0_17 = arith.constant 0 : index
    %34 = vector.load %arg5[%c0_16, %c0_17] : memref<1x128xf32, #tpu.memory_space<vmem>>, vector<1x128xf32>
    tpu.vector_store %arg5[%c0_16, %c0_17], %33 {strides = array<i32>} : memref<1x128xf32, #tpu.memory_space<vmem>>, vector<1x128xf32>,
    %c0_18 = arith.constant 0 : index
    %c0_19 = arith.constant 0 : index
    %35 = vector.load %arg6[%c0_18, %c0_19] : memref<1x128xf32, #tpu.memory_space<vmem>>, vector<1x128xf32>
    %cst_20 = arith.constant dense<0.000000e+00> : vector<128xf32>
    %36 = vector.multi_reduction <add>, %22, %cst_20 [0] : vector<16x128xf32> to vector<128xf32>
    %37 = vector.shape_cast %36 : vector<128xf32> to vector<1x128xf32>
    %38 = arith.addf %35, %37 : vector<1x128xf32>
    %c0_21 = arith.constant 0 : index
    %c0_22 = arith.constant 0 : index
    %39 = vector.load %arg6[%c0_21, %c0_22] : memref<1x128xf32, #tpu.memory_space<vmem>>, vector<1x128xf32>
    tpu.vector_store %arg6[%c0_21, %c0_22], %38 {strides = array<i32>} : memref<1x128xf32, #tpu.memory_space<vmem>>, vector<1x128xf32>,
    %c0_i32_23 = arith.constant 0 : i32
    %40 = arith.cmpi eq, %arg0, %c0_i32_23 : i32
    %41 = arith.extui %40 : i1 to i32
    %c0_i32_24 = arith.constant 0 : i32
    %42 = arith.cmpi ne, %41, %c0_i32_24 : i32
    scf.if %42 {
      %c0_25 = arith.constant 0 : index
      %c0_26 = arith.constant 0 : index
      %43 = vector.load %arg4[%c0_25, %c0_26] : memref<1x128xf32, #tpu.memory_space<vmem>>, vector<1x128xf32>
      %44 = vector.shape_cast %43 : vector<1x128xf32> to vector<1x1x128xf32>
      %cst_27 = arith.constant dense<0.000000e+00> : vector<1xf32>
      %45 = vector.multi_reduction <add>, %44, %cst_27 [1, 2] : vector<1x1x128xf32> to vector<1xf32>
      %46 = vector.shape_cast %45 : vector<1xf32> to vector<1x1x1xf32>
      %47 = vector.extract %46[0, 0, 0] : f32 from vector<1x1x1xf32>
      %c0_28 = arith.constant 0 : index
      %c0_29 = arith.constant 0 : index
      %48 = vector.load %arg5[%c0_28, %c0_29] : memref<1x128xf32, #tpu.memory_space<vmem>>, vector<1x128xf32>
      %49 = vector.shape_cast %48 : vector<1x128xf32> to vector<1x1x128xf32>
      %cst_30 = arith.constant dense<0.000000e+00> : vector<1xf32>
      %50 = vector.multi_reduction <add>, %49, %cst_30 [1, 2] : vector<1x1x128xf32> to vector<1xf32>
      %51 = vector.shape_cast %50 : vector<1xf32> to vector<1x1x1xf32>
      %52 = vector.extract %51[0, 0, 0] : f32 from vector<1x1x1xf32>
      %c0_31 = arith.constant 0 : index
      %c0_32 = arith.constant 0 : index
      %53 = vector.load %arg6[%c0_31, %c0_32] : memref<1x128xf32, #tpu.memory_space<vmem>>, vector<1x128xf32>
      %54 = vector.shape_cast %53 : vector<1x128xf32> to vector<1x1x128xf32>
      %cst_33 = arith.constant dense<0.000000e+00> : vector<1xf32>
      %55 = vector.multi_reduction <add>, %54, %cst_33 [1, 2] : vector<1x1x128xf32> to vector<1xf32>
      %56 = vector.shape_cast %55 : vector<1xf32> to vector<1x1x1xf32>
      %57 = vector.extract %56[0, 0, 0] : f32 from vector<1x1x1xf32>
      %cst_34 = arith.constant 2.000000e+00 : f32
      %58 = arith.mulf %cst_34, %47 : f32
      %cst_35 = arith.constant 1.000000e-07 : f32
      %59 = arith.addf %58, %cst_35 : f32
      %cst_36 = arith.constant 1.000000e-07 : f32
      %60 = arith.addf %52, %cst_36 : f32
      %61 = arith.divf %59, %60 : f32
      %cst_37 = arith.constant 1.000000e+00 : f32
      %62 = arith.subf %cst_37, %61 : f32
      %cst_38 = arith.constant 2.048000e+03 : f32
      %63 = arith.divf %57, %cst_38 : f32
      %64 = arith.addf %62, %63 : f32
      %c0_39 = arith.constant 0 : index
      %c0_40 = arith.constant 0 : index
      %65 = memref.load %arg3[%c0_39, %c0_40] : memref<1x1xf32, #tpu.memory_space<smem>>
      memref.store %64, %arg3[%c0_39, %c0_40] : memref<1x1xf32, #tpu.memory_space<smem>>
    } else {
    }
    return
  }
  func.func @transform_0(%arg0: i32) -> (i32, i32) {
    %c0_i32 = arith.constant 0 : i32
    %c0_i32_0 = arith.constant 0 : i32
    return %arg0, %c0_i32 : i32, i32
  }
  func.func @transform_1(%arg0: i32) -> (i32, i32) {
    %c0_i32 = arith.constant 0 : i32
    %c0_i32_0 = arith.constant 0 : i32
    return %arg0, %c0_i32 : i32, i32
  }
  func.func @transform_2(%arg0: i32) -> (i32, i32) {
    %c0_i32 = arith.constant 0 : i32
    %c0_i32_0 = arith.constant 0 : i32
    %c0_i32_1 = arith.constant 0 : i32
    return %c0_i32, %c0_i32_0 : i32, i32
  }
}

</mosaic_0001>

<bundles_post_ra>
// kernel: tpu_custom_call.1
= control target key start
LH: loop header
LB: loop body
LE: loop exit
PB: predicated region body
PF: predicated region fallthrough
CT: control target
= control target key end

     0   :  { %7 = vsyncpa [#allocation6], 0  ;;  %s309_s0 = inlined_call_operand.hbm [shape: f32[16,128], index: 0, kind: input, shape index: {}]   ;;  %s310_s1 = inlined_call_operand.hbm [shape: f32[16,128], index: 1, kind: input, shape index: {}]   ;;  %s311_s2 = inlined_call_operand.hbm [shape: f32[1,1], index: 2, kind: output, shape index: {}]  }
   0x1   :  { %8 = vsyncpa [#allocation9], 0 }
   0x2   :  { %9 = vsyncpa [#allocation7], 0  ;;  %s279_s9 = smov [#allocation5]  }
   0x3   :  { %s15_s10 = sshll.u32 %s279_s9, 4  ;;  %s16_s10 = int_to_ptr.vmem [resolvable:$true] %s15_s10 }
   0x4   :  { %s233_s11 = scalar_lea.vmem %s16_s10, 256  ;;  %p238_p1 = scmp.lt.s32.totalorder %s16_s10, %s16_s10 }
   0x5   :  { %p234_p0 = scmp.ne.s32.totalorder %s16_s10, %s233_s11  ;;  %p239_p2 = scmp.lt.s32.totalorder %s233_s11, %s233_s11 }
   0x7   :  { %p240_p3 = por %p239_p2, %p238_p1 }
   0x9   :  { %p241_p4 = pnand %p240_p3, %p234_p0 }
   0xb   :  { %244 = shalt.err (!%p241_p4)
}
   0xc   :  { %s280_s12 = smov 128   ;;  %s281_s13 = smov 8  }
   0xd   :  { %21 = dma.hbm_to_vmem [thread:$0]  %s309_s0, 256, %s16_s10, [#allocation6], %s280_s12, %s280_s12, %s281_s13  }
   0xe   :  { %s282_s16 = smov [#allocation8]  }
   0xf   :  { %s27_s17 = sshll.u32 %s282_s16, 4  ;;  %s28_s17 = int_to_ptr.vmem [resolvable:$true] %s27_s17 }
  0x10   :  { %s253_s18 = scalar_lea.vmem %s28_s17, 256  ;;  %p258_p6 = scmp.lt.s32.totalorder %s28_s17, %s28_s17 }
  0x11   :  { %p254_p5 = scmp.ne.s32.totalorder %s28_s17, %s253_s18  ;;  %p259_p7 = scmp.lt.s32.totalorder %s253_s18, %s253_s18 }
  0x13   :  { %p260_p8 = por %p259_p7, %p258_p6 }
  0x15   :  { %p261_p9 = pnand %p260_p8, %p254_p5 }
  0x17   :  { %264 = shalt.err (!%p261_p9)
}
  0x18   :  { %33 = dma.hbm_to_vmem [thread:$0]  %s310_s1, 256, %s28_s17, [#allocation9], %s280_s12, %s280_s12, %s281_s13  }
  0x19   :  { %273 = dma.done.wait [#allocation6], 256  }
  0x1a   :  { %274 = vsyncadd [#allocation6], 4294967040 }
  0x1b   :  { %275 = dma.done.wait [#allocation9], 256  }
  0x1c   :  { %276 = vsyncadd [#allocation9], 4294967040  ;;  %v283_v0 = vmov 0.0   ;;  %v47_v1 = vld [vmem:[#allocation5] sm:$0xff]  ;;  %v48_v2 = vld [vmem:[#allocation5 + $0x8] sm:$0xff]  ;;  %vm135_vm4 = vcmask 1040384  }
  0x1d   :  { %44 = vst [vmem:[#allocation2] sm:$0x1] %v283_v0  ;;  %45 = vst [vmem:[#allocation3] sm:$0x1] %v283_v0  ;;  %v51_v3 = vand.u32 2147483647, %v47_v1 }
  0x1e   :  { %46 = vst [vmem:[#allocation4] sm:$0x1] %v283_v0  ;;  %v52_v4 = vand.u32 2147483647, %v48_v2  ;;  %v49_v15 = vld [vmem:[#allocation8] sm:$0xff]  ;;  %v50_v17 = vld [vmem:[#allocation8 + $0x8] sm:$0xff] }
  0x1f   :  { %v53_v5 = vsub.f32 0.0, %v51_v3  ;;  %v71_v18 = vmax.f32 %v47_v1, 0.0  ;;  %v73_v19 = vmul.f32 %v49_v15, %v47_v1  ;;  %v72_v22 = vmax.f32 %v48_v2, 0.0  ;;  %s284_s30 = smov [#allocation10]  }
  0x20   :  { %v54_v6 = vsub.f32 0.0, %v52_v4  ;;  %v74_v23 = vmul.f32 %v50_v17, %v48_v2  ;;  %vm65_vm0 = vcmp.ge.f32.partialorder %v47_v1, 0.0  ;;  %vm66_vm1 = vcmp.ge.f32.partialorder %v48_v2, 0.0 }
  0x21   :  { %v55_v7 = vmul.f32 1.442695, %v53_v5  ;;  %v75_v31 = vsub.f32 %v71_v18, %v73_v19 }
  0x22   :  { %v57_v8 = vmul.f32 1.442695, %v54_v6  ;;  %v76_v35 = vsub.f32 %v72_v22, %v74_v23 }
  0x23   :  { %211 = vpow2.f32 %v55_v7 }
  0x24   :  { %213 = vpow2.f32 %v57_v8  ;;  %v101_v0 = vld [vmem:[#allocation2] sm:$0x1]  ;;  %v111_v1 = vld [vmem:[#allocation3] sm:$0x1] }
  0x25   :  { %v121_v5 = vld [vmem:[#allocation4] sm:$0x1] }
  0x30   :  { %v212_v9 = vpop.eup %211 }
  0x31   :  { %v214_v10 = vpop.eup %213  ;;  %v59_v11 = vadd.f32 1.0, %v212_v9  ;;  %v80_v13 = vmul.f32 -0.5, %v212_v9  ;;  %v83_v20 = vand.u32 2147483647, %v212_v9 }
  0x32   :  { %v60_v12 = vadd.f32 1.0, %v214_v10  ;;  %v89_v14 = vmul.f32 -0.5, %v214_v10  ;;  %v92_v24 = vand.u32 2147483647, %v214_v10 }
  0x33   :  { %215 = vrcp.f32 %v59_v11  ;;  %v81_v16 = vadd.f32 1.0, %v80_v13  ;;  %vm84_vm2 = vcmp.lt.f32.partialorder %v83_v20, 0.0004427343 }
  0x34   :  { %217 = vrcp.f32 %v60_v12  ;;  %v90_v21 = vadd.f32 1.0, %v89_v14  ;;  %vm93_vm3 = vcmp.lt.f32.partialorder %v92_v24, 0.0004427343 }
  0x35   :  { %219 = vlog2.f32 %v59_v11  ;;  %v82_v28 = vmul.f32 %v212_v9, %v81_v16 }
  0x36   :  { %221 = vlog2.f32 %v60_v12  ;;  %v91_v32 = vmul.f32 %v214_v10, %v90_v21 }
  0x40   :  { %v216_v25 = vpop.eup %215 }
  0x41   :  { %v218_v26 = vpop.eup %217  ;;  %v67_v27 = vmul.f32 %v216_v25, %v212_v9 }
  0x42   :  { %v220_v29 = vpop.eup %219  ;;  %v68_v30 = vmul.f32 %v218_v26, %v214_v10 }
  0x43   :  { %v222_v33 = vpop.eup %221  ;;  %v69_v34 = vsel %vm65_vm0, %v216_v25, %v67_v27  ;;  %v79_v36 = vmul.f32 0.6931472, %v220_v29 }
  0x44   :  { %v70_v37 = vsel %vm66_vm1, %v218_v26, %v68_v30  ;;  %v97_v38 = vmul.f32 %v69_v34, %v49_v15  ;;  %v99_v39 = vadd.f32 %v69_v34, %v49_v15  ;;  %v88_v40 = vmul.f32 0.6931472, %v222_v33 }
  0x45   :  { %v98_v41 = vmul.f32 %v70_v37, %v50_v17  ;;  %v100_v42 = vadd.f32 %v70_v37, %v50_v17  ;;  %v85_v43 = vsel %vm84_vm2, %v82_v28, %v79_v36 }
  0x46   :  { %v94_v44 = vsel %vm93_vm3, %v91_v32, %v88_v40  ;;  %v95_v45 = vadd.f32 %v85_v43, %v75_v31 }
  0x47   :  { %v102_v46 = vadd.f32 %v98_v41, %v97_v38  ;;  %v112_v47 = vadd.f32 %v100_v42, %v99_v39  ;;  %v96_v48 = vadd.f32 %v94_v44, %v76_v35 }
  0x49   :  { %v103_v49 = vrot.slane %v102_v46, 4  ;;  %v113_v50 = vrot.slane %v112_v47, 4  ;;  %v122_v51 = vadd.f32 %v96_v48, %v95_v45 }
  0x4b   :  { %v104_v52 = vadd.f32 %v103_v49, %v102_v46  ;;  %v114_v53 = vadd.f32 %v113_v50, %v112_v47  ;;  %v123_v54 = vrot.slane %v122_v51, 4 }
  0x4d   :  { %v105_v55 = vrot.slane %v104_v52, 2  ;;  %v115_v56 = vrot.slane %v114_v53, 2  ;;  %v124_v57 = vadd.f32 %v123_v54, %v122_v51 }
  0x4f   :  { %v106_v58 = vadd.f32 %v105_v55, %v104_v52  ;;  %v116_v59 = vadd.f32 %v115_v56, %v114_v53  ;;  %v125_v60 = vrot.slane %v124_v57, 2 }
  0x51   :  { %v107_v61 = vrot.slane %v106_v58, 1  ;;  %v117_v62 = vrot.slane %v116_v59, 1  ;;  %v126_v63 = vadd.f32 %v125_v60, %v124_v57 }
  0x53   :  { %v108_v2 = vadd.f32 %v107_v61, %v106_v58  ;;  %v118_v3 = vadd.f32 %v117_v62, %v116_v59  ;;  %v127_v4 = vrot.slane %v126_v63, 1 }
  0x55   :  { %v109_v6 = vadd.f32 %v108_v2, %v101_v0  ;;  %v119_v7 = vadd.f32 %v118_v3, %v111_v1  ;;  %v128_v8 = vadd.f32 %v127_v4, %v126_v63 }
  0x57   :  { %110 = vst [vmem:[#allocation2] sm:$0x1] %v109_v6  ;;  %120 = vst [vmem:[#allocation3] sm:$0x1] %v119_v7  ;;  %v129_v9 = vadd.f32 %v128_v8, %v121_v5 }
  0x59   :  { %130 = vst [vmem:[#allocation4] sm:$0x1] %v129_v9 }
  0x5e   :  { %v134_v10 = vld [vmem:[#allocation2] sm:$0x1]  ;;  %v146_v11 = vld [vmem:[#allocation3] sm:$0x1] }
  0x5f   :  { %v136_v12 = vsel %vm135_vm4, %v134_v10, 0.0  ;;  %v147_v14 = vsel %vm135_vm4, %v146_v11, 0.0 }
  0x60   :  { %137 = vadd.xlane.f32.xlu0 %v136_v12  ;;  %v157_v13 = vld [vmem:[#allocation4] sm:$0x1] }
  0x61   :  { %v158_v15 = vsel %vm135_vm4, %v157_v13, 0.0 }
  0x62   :  { %159 = vadd.xlane.f32.xlu1 %v158_v15 }
  0x64   :  { %148 = vadd.xlane.f32.xlu0 %v147_v14 }
  0xe9   :  { %v138_v16 = vpop.xlane.xlu0 %137 }
  0xea   :  { %v139_v17 = vrot.slane %v138_v16, 4 }
  0xeb   :  { %v160_v18 = vpop.xlane.xlu1 %159 }
  0xec   :  { %v140_v19 = vadd.f32 %v139_v17, %v138_v16  ;;  %v161_v20 = vrot.slane %v160_v18, 4 }
  0xed   :  { %v149_v21 = vpop.xlane.xlu0 %148 }
  0xee   :  { %v141_v22 = vrot.slane %v140_v19, 2  ;;  %v150_v23 = vrot.slane %v149_v21, 4  ;;  %v162_v24 = vadd.f32 %v161_v20, %v160_v18 }
  0xf0   :  { %v151_v25 = vadd.f32 %v150_v23, %v149_v21  ;;  %v142_v26 = vadd.f32 %v141_v22, %v140_v19  ;;  %v163_v27 = vrot.slane %v162_v24, 2 }
  0xf2   :  { %v152_v28 = vrot.slane %v151_v25, 2  ;;  %v143_v29 = vrot.slane %v142_v26, 1  ;;  %v164_v30 = vadd.f32 %v163_v27, %v162_v24 }
  0xf4   :  { %v153_v31 = vadd.f32 %v152_v28, %v151_v25  ;;  %v144_v32 = vadd.f32 %v143_v29, %v142_v26  ;;  %v165_v33 = vrot.slane %v164_v30, 1 }
  0xf6   :  { %197 = vpush %v144_v32  ;;  %v154_v34 = vrot.slane %v153_v31, 1  ;;  %v166_v35 = vadd.f32 %v165_v33, %v164_v30 }
  0xf8   :  { %v155_v36 = vadd.f32 %v154_v34, %v153_v31 }
  0xfa   :  { %199 = vpush %v155_v36 }
  0xfb   :  { %201 = vpush %v166_v35 }
 0x127   :  { %s198_s0 = spop %197 }
 0x128   :  { %s168_s22 = smul.f32 2.0, %s198_s0 }
 0x12a   :  { %s169_s23 = sadd.f32 1e-07, %s168_s22 }
 0x12b   :  { %s200_s1 = spop %199 }
 0x12c   :  { %s170_s21 = sadd.f32 1e-07, %s200_s1  ;;  %s202_s24 = spop %201 }
 0x12d   :  { %s178_s27 = smul.f32 0.00048828125, %s202_s24 }
 0x12e   :  { %v171_v37 = vstv %s170_s21 }
 0x12f   :  { %223 = vrcp.f32 %v171_v37 }
 0x13c   :  { %v224_v38 = vpop.eup %223 }
 0x13d   :  { %203 = vpush %v224_v38 }
 0x16e   :  { %s204_s25 = spop %203 }
 0x16f   :  { %s174_s26 = smul.f32 %s204_s25, %s169_s23 }
 0x171   :  { %s175_s28 = ssub.f32 1.0, %s174_s26 }
 0x173   :  { %s179_s29 = sadd.f32 %s178_s27, %s175_s28 }
 0x175   :  { %181 = sst [smem:[#allocation10]] %s179_s29 }
 0x176   :  { %189 = dma.smem_to_hbm %s284_s30, 16, %s311_s2, [#allocation7]  }
 0x177   :  { %277 = dma.done.wait [#allocation7], 16  }
 0x178   :  { %278 = vsyncadd [#allocation7], 4294967280 }
 0x179   :  { %193 = sfence }
 0x17a   :  { %194 = vsyncpa [#allocation6], 1 }
 0x17b   :  { %195 = vsyncpa [#allocation9], 1 }
 0x17c   :  { %196 = vsyncpa [#allocation7], 1 }

</bundles_post_ra>
